<compile_context>
chip_gen: v5e
topology: v5e:2x2
jax: 0.10.0
libtpu: 0.0.40
codegen_flags: <defaults>
</compile_context>

<pallas_src>
import jax
import jax.numpy as jnp
from jax.experimental import pallas as pl
from jax.experimental.pallas import tpu as pltpu


def _discriminator_kernel(x_ref, a_ref, w1x_ref, w1a_ref, b1_ref, w2_ref,
                          b2_ref, o_ref):
    # First layer: fused "concat" as a split matmul on the MXU.
    # (TB, S) @ (S, H) + (TB, A) @ (A, H) -> (TB, H)
    h = jnp.dot(x_ref[...], w1x_ref[...], preferred_element_type=jnp.float32)
    h = h + jnp.dot(a_ref[...], w1a_ref[...], preferred_element_type=jnp.float32)
    h = jnp.maximum(h + b1_ref[...], 0.0)                 # bias + ReLU (VPU)

    # Second layer: N=1, so use an XLU cross-lane reduction instead of the MXU.
    # w2_ref is (1, H) and broadcasts over the batch rows.
    logit = jnp.sum(h * w2_ref[...], axis=-1, keepdims=True)   # (TB, 1)
    logit = logit + b2_ref[0, 0]                               # scalar from SMEM

    # sigmoid = 1 / (1 + exp(-x)); exp and approx reciprocal both run on the EUP.
    o_ref[...] = pl.reciprocal(1.0 + jnp.exp(-logit), approx=True)


def discriminator_forward(x, a, params, *, tile_b=1024):
    """x: (B, state_dim) f32, a: (B, action_dim) f32 -> (B, 1) f32."""
    w1x, w1a = params["w1x"], params["w1a"]
    b1, w2, b2 = params["b1"], params["w2"], params["b2"]

    B, S = x.shape
    A = a.shape[1]
    H = w1x.shape[1]

    # Batch tile: full batch if it fits in one tile, otherwise a multiple-of-8
    # tile so the (8,128) BlockSpec constraint is satisfied.
    tb = B if B <= tile_b else tile_b
    num_tiles = pl.cdiv(B, tb)

    return pl.pallas_call(
        _discriminator_kernel,
        out_shape=jax.ShapeDtypeStruct((B, 1), jnp.float32),
        grid=(num_tiles,),
        in_specs=[
            pl.BlockSpec((tb, S), lambda i: (i, 0)),       # x tile
            pl.BlockSpec((tb, A), lambda i: (i, 0)),       # a tile
            pl.BlockSpec((S, H), lambda i: (0, 0)),        # W1x (resident)
            pl.BlockSpec((A, H), lambda i: (0, 0)),        # W1a (resident)
            pl.BlockSpec((1, H), lambda i: (0, 0)),        # b1
            pl.BlockSpec((1, H), lambda i: (0, 0)),        # w2 as a row
            pl.BlockSpec((1, 1), lambda i: (0, 0),
                         memory_space=pltpu.MemorySpace.SMEM),  # b2 scalar
        ],
        out_specs=pl.BlockSpec((tb, 1), lambda i: (i, 0)),
        compiler_params=pltpu.CompilerParams(
            dimension_semantics=("parallel",),             # 2x on v7x dual-TC
        ),
    )(x, a, w1x, w1a, b1, w2, b2)


def init_params(key, state_dim, hidden_dim, action_dim):
    """Deterministic init mirroring nn.Linear; W1 stored pre-split/transposed."""
    k1, k2, k3, k4 = jax.random.split(key, 4)
    in_dim = state_dim + action_dim
    lim1 = 1.0 / jnp.sqrt(in_dim)
    lim2 = 1.0 / jnp.sqrt(hidden_dim)
    # torch fc1.weight is (H, S+A); we store its transpose, split into x/a parts.
    w1 = jax.random.uniform(k1, (in_dim, hidden_dim), jnp.float32, -lim1, lim1)
    return {
        "w1x": w1[:state_dim, :],                                   # (S, H)
        "w1a": w1[state_dim:, :],                                   # (A, H)
        "b1": jax.random.uniform(k2, (1, hidden_dim), jnp.float32, -lim1, lim1),
        # torch fc2.weight is (1, H); we keep that row orientation.
        "w2": jax.random.uniform(k3, (1, hidden_dim), jnp.float32, -lim2, lim2),
        "b2": jax.random.uniform(k4, (1, 1), jnp.float32, -lim2, lim2),
    }


if __name__ == "__main__":
    state_dim, hidden_dim, action_dim = 16, 32, 4
    batch = 64

    key = jax.random.PRNGKey(0)
    kp, kx, ka = jax.random.split(key, 3)

    params = init_params(kp, state_dim, hidden_dim, action_dim)
    x = jax.random.normal(kx, (batch, state_dim), jnp.float32)
    a = jax.random.normal(ka, (batch, action_dim), jnp.float32)

    # tile_b=32 -> 2 batch tiles, exercising the pipelined/parallel grid.
    out = discriminator_forward(x, a, params, tile_b=32)
    out = jax.block_until_ready(out)

    # Pure-JAX reference check (same math, no Pallas).
    cat = jnp.concatenate([x, a], axis=1)
    w1_full = jnp.concatenate([params["w1x"], params["w1a"]], axis=0)
    ref = jax.nn.sigmoid(
        jnp.maximum(cat @ w1_full + params["b1"], 0.0) @ params["w2"].T
        + params["b2"]
    )
    assert out.shape == (batch, 1)
    # slightly relaxed tolerance: pl.reciprocal(approx=True) is an EUP estimate
    assert jnp.allclose(out, ref, atol=2e-3, rtol=2e-3)

    print("KERNEL_OK")
</pallas_src>

<mosaic_0001>
module attributes {stable_mosaic.version = 11 : i64} {
  func.func @_discriminator_kernel(%arg0: i32, %arg1: memref<32x16xf32, #tpu.memory_space<vmem>>, %arg2: memref<32x4xf32, #tpu.memory_space<vmem>>, %arg3: memref<16x32xf32, #tpu.memory_space<vmem>>, %arg4: memref<4x32xf32, #tpu.memory_space<vmem>>, %arg5: memref<1x32xf32, #tpu.memory_space<vmem>>, %arg6: memref<1x32xf32, #tpu.memory_space<vmem>>, %arg7: memref<1x1xf32, #tpu.memory_space<smem>>, %arg8: memref<32x1xf32, #tpu.memory_space<vmem>>) attributes {dimension_semantics = [#tpu.dimension_semantics<parallel>], iteration_bounds = array<i64: 2>, scalar_prefetch = 0 : i64, scratch_operands = 0 : i64, tpu.core_type = #tpu.core_type<tc>, window_params = [{transform_indices = @transform_0, window_bounds = array<i64: 32, 16>}, {transform_indices = @transform_1, window_bounds = array<i64: 32, 4>}, {pipeline_mode = #tpu.pipeline_mode<synchronous>, transform_indices = @transform_2, window_bounds = array<i64: 16, 32>}, {pipeline_mode = #tpu.pipeline_mode<synchronous>, transform_indices = @transform_3, window_bounds = array<i64: 4, 32>}, {pipeline_mode = #tpu.pipeline_mode<synchronous>, transform_indices = @transform_4, window_bounds = array<i64: 1, 32>}, {pipeline_mode = #tpu.pipeline_mode<synchronous>, transform_indices = @transform_5, window_bounds = array<i64: 1, 32>}, {transform_indices = @transform_6, window_bounds = array<i64: 1, 1>}, {transform_indices = @transform_7, window_bounds = array<i64: 32, 1>}]} {
    %c0 = arith.constant 0 : index
    %c0_0 = arith.constant 0 : index
    %0 = vector.load %arg1[%c0, %c0_0] : memref<32x16xf32, #tpu.memory_space<vmem>>, vector<32x16xf32>
    %c0_1 = arith.constant 0 : index
    %c0_2 = arith.constant 0 : index
    %1 = vector.load %arg3[%c0_1, %c0_2] : memref<16x32xf32, #tpu.memory_space<vmem>>, vector<16x32xf32>
    %cst = arith.constant dense<0.000000e+00> : vector<32x32xf32>
    %2 = tpu.matmul %0, %1, %cst {dimension_numbers = #tpu.dot_dimension_numbers<[1], [0], [0], [1], [0, 0, 1, 1], [], []>} : vector<32x16xf32>, vector<16x32xf32>, vector<32x32xf32> -> vector<32x32xf32>
    %c0_3 = arith.constant 0 : index
    %c0_4 = arith.constant 0 : index
    %3 = vector.load %arg2[%c0_3, %c0_4] : memref<32x4xf32, #tpu.memory_space<vmem>>, vector<32x4xf32>
    %c0_5 = arith.constant 0 : index
    %c0_6 = arith.constant 0 : index
    %4 = vector.load %arg4[%c0_5, %c0_6] : memref<4x32xf32, #tpu.memory_space<vmem>>, vector<4x32xf32>
    %cst_7 = arith.constant dense<0.000000e+00> : vector<32x32xf32>
    %5 = tpu.matmul %3, %4, %cst_7 {dimension_numbers = #tpu.dot_dimension_numbers<[1], [0], [0], [1], [0, 0, 1, 1], [], []>} : vector<32x4xf32>, vector<4x32xf32>, vector<32x32xf32> -> vector<32x32xf32>
    %6 = arith.addf %2, %5 : vector<32x32xf32>
    %c0_8 = arith.constant 0 : index
    %c0_9 = arith.constant 0 : index
    %7 = vector.load %arg5[%c0_8, %c0_9] : memref<1x32xf32, #tpu.memory_space<vmem>>, vector<1x32xf32>
    %8 = vector.broadcast %7 : vector<1x32xf32> to vector<32x32xf32>
    %9 = arith.addf %6, %8 : vector<32x32xf32>
    %cst_10 = arith.constant 0.000000e+00 : f32
    %10 = vector.broadcast %cst_10 : f32 to vector<32x32xf32>
    %11 = arith.maximumf %9, %10 : vector<32x32xf32>
    %c0_11 = arith.constant 0 : index
    %c0_12 = arith.constant 0 : index
    %12 = vector.load %arg6[%c0_11, %c0_12] : memref<1x32xf32, #tpu.memory_space<vmem>>, vector<1x32xf32>
    %13 = vector.broadcast %12 : vector<1x32xf32> to vector<32x32xf32>
    %14 = arith.mulf %11, %13 : vector<32x32xf32>
    %cst_13 = arith.constant dense<0.000000e+00> : vector<32xf32>
    %15 = vector.multi_reduction <add>, %14, %cst_13 [1] : vector<32x32xf32> to vector<32xf32>
    %16 = vector.shape_cast %15 : vector<32xf32> to vector<32x1xf32>
    %c0_14 = arith.constant 0 : index
    %c0_15 = arith.constant 0 : index
    %17 = memref.load %arg7[%c0_14, %c0_15] : memref<1x1xf32, #tpu.memory_space<smem>>
    %18 = vector.broadcast %17 : f32 to vector<32x1xf32>
    %19 = arith.addf %16, %18 : vector<32x1xf32>
    %cst_16 = arith.constant 0.000000e+00 : f32
    %20 = vector.broadcast %cst_16 : f32 to vector<32x1xf32>
    %21 = arith.subf %20, %19 : vector<32x1xf32>
    %22 = math.exp %21 : vector<32x1xf32>
    %cst_17 = arith.constant 1.000000e+00 : f32
    %23 = vector.broadcast %cst_17 : f32 to vector<32x1xf32>
    %24 = arith.addf %23, %22 : vector<32x1xf32>
    %25 = tpu.reciprocal %24 {approx = true} : vector<32x1xf32> -> vector<32x1xf32>
    %c0_18 = arith.constant 0 : index
    %c0_19 = arith.constant 0 : index
    %26 = vector.load %arg8[%c0_18, %c0_19] : memref<32x1xf32, #tpu.memory_space<vmem>>, vector<32x1xf32>
    tpu.vector_store %arg8[%c0_18, %c0_19], %25 {strides = array<i32>} : memref<32x1xf32, #tpu.memory_space<vmem>>, vector<32x1xf32>,
    return
  }
  func.func @transform_0(%arg0: i32) -> (i32, i32) {
    %c0_i32 = arith.constant 0 : i32
    %c0_i32_0 = arith.constant 0 : i32
    return %arg0, %c0_i32 : i32, i32
  }
  func.func @transform_1(%arg0: i32) -> (i32, i32) {
    %c0_i32 = arith.constant 0 : i32
    %c0_i32_0 = arith.constant 0 : i32
    return %arg0, %c0_i32 : i32, i32
  }
  func.func @transform_2(%arg0: i32) -> (i32, i32) {
    %c0_i32 = arith.constant 0 : i32
    %c0_i32_0 = arith.constant 0 : i32
    %c0_i32_1 = arith.constant 0 : i32
    return %c0_i32, %c0_i32_0 : i32, i32
  }
  func.func @transform_3(%arg0: i32) -> (i32, i32) {
    %c0_i32 = arith.constant 0 : i32
    %c0_i32_0 = arith.constant 0 : i32
    %c0_i32_1 = arith.constant 0 : i32
    return %c0_i32, %c0_i32_0 : i32, i32
  }
  func.func @transform_4(%arg0: i32) -> (i32, i32) {
    %c0_i32 = arith.constant 0 : i32
    %c0_i32_0 = arith.constant 0 : i32
    %c0_i32_1 = arith.constant 0 : i32
    return %c0_i32, %c0_i32_0 : i32, i32
  }
  func.func @transform_5(%arg0: i32) -> (i32, i32) {
    %c0_i32 = arith.constant 0 : i32
    %c0_i32_0 = arith.constant 0 : i32
    %c0_i32_1 = arith.constant 0 : i32
    return %c0_i32, %c0_i32_0 : i32, i32
  }
  func.func @transform_6(%arg0: i32) -> (i32, i32) {
    %c0_i32 = arith.constant 0 : i32
    %c0_i32_0 = arith.constant 0 : i32
    %c0_i32_1 = arith.constant 0 : i32
    return %c0_i32, %c0_i32_0 : i32, i32
  }
  func.func @transform_7(%arg0: i32) -> (i32, i32) {
    %c0_i32 = arith.constant 0 : i32
    %c0_i32_0 = arith.constant 0 : i32
    return %arg0, %c0_i32 : i32, i32
  }
}

</mosaic_0001>

<bundles_post_ra>
// kernel: tpu_custom_call.1
= control target key start
LH: loop header
LB: loop body
LE: loop exit
PB: predicated region body
PF: predicated region fallthrough
CT: control target
= control target key end

     0   :  { %s638_s26 = smov 0   ;;  %s690_s0 = inlined_call_operand.vmem [shape: f32[64,16], index: 0, kind: input, shape index: {}]   ;;  %s691_s1 = inlined_call_operand.vmem [shape: f32[64,4], index: 1, kind: input, shape index: {}]   ;;  %s692_s2 = inlined_call_operand.vmem [shape: f32[16,32], index: 2, kind: input, shape index: {}]   ;;  %s693_s3 = inlined_call_operand.vmem [shape: f32[4,32], index: 3, kind: input, shape index: {}]   ;;  %s694_s4 = inlined_call_operand.vmem [shape: f32[1,32], index: 4, kind: input, shape index: {}]   ;;  %s695_s5 = inlined_call_operand.vmem [shape: f32[1,32], index: 5, kind: input, shape index: {}]   ;;  %s696_s6 = inlined_call_operand.<no memory space> [shape: f32[1,1], index: 6, kind: input, shape index: {}]   ;;  %s697_s7 = inlined_call_operand.vmem [shape: f32[64,1], index: 7, kind: output, shape index: {}]  }
   0x1   :  { %12 = sst [smem:[#allocation2]] %s696_s6 }
   0x2 LB: > { %s536_s27 = sadd.s32 4294967295, %s593_s26   ;;  %p540_p0 = scmp.ge.s32.totalorder %s593_s26, 1  ;;  %s593_s26 = sphi %s638_s26, %s18_s26  }
   0x3   : > { %p250_p1 = scmp.lt.s32.totalorder %s593_s26, 3 }
   0x5   : > { %p251_p2 = pnand %p540_p0, %p250_p1 }
   0x6   : > { %s541_s10 = sshll.u32 (!%p251_p2), %s536_s27, 2  ;;  %s437_s22 = sld [smem:[#allocation2]] (!%p251_p2) }
   0x7   : > { %254 = sbr.rel (%p251_p2) target bundleno = 313 (0x139), region = 48  ;;  %p288_p3 = scmp.lt.s32.totalorder (!%p251_p2), %s541_s10, 7 }
   0xc   : > { %v310_v0 = vld [vmem:[%s692_s2 + $0x8] sm:$0xff]  ;;  %v315_v1 = vld [vmem:[%s693_s3] sm:$0xf]  ;;  %vm329_vm0 = vcmask 1043456   ;;  %s699_s10 = smov (!%p288_p3, %s541_s10), 7  ;;  %vm316_vm1 = vcmask 31744   ;;  %v438_v41 = vstv %s437_s22 }
   0xd   : > { %v309_v2 = vld [vmem:[%s692_s2] sm:$0xff]  ;;  %389 = vmatpush.msra.mxu1 %v310_v0  ;;  %547 = vmatpush.msk.msra.mxu0 %vm329_vm0, %v315_v1  ;;  %s655_s11 = sshll.u32 %s699_s10, 3  ;;  %vm362_vm2 = vcmask 130048   ;;  %vm424_vm3 = vcmask 261120   ;;  %vm463_vm4 = vcmask 7168  }
   0xe   : > { %558 = vmatpush.msk.msra.mxu3 %vm329_vm0, %v315_v1  ;;  %559 = vmatpush.msra.mxu2 %v310_v0  ;;  %s297_s14 = scalar_lea.vmem %s691_s1, %s655_s11  ;;  %s291_s17 = scalar_lea.vmem %s690_s0, %s655_s11  ;;  %v569_v12 = vld [vmem:[%s694_s4] ss:$0 sm:$0xff] }
   0xf   : > { %390 = vmatpush.msra.mxu1 %v309_v2  ;;  %v311_v3 = vld [vmem:[%s297_s14] sm:$0xff]  ;;  %v312_v4 = vld [vmem:[%s297_s14 + $0x8] sm:$0xff]  ;;  %v307_v6 = vld [vmem:[%s291_s17 + $0x10] sm:$0xff]  ;;  %s303_s25 = scalar_lea.vmem %s697_s7, %s655_s11 }
  0x10   : > { %560 = vmatpush.msra.mxu2 %v309_v2  ;;  %548 = vmatmul.msk.f32.vlgmr.msra.gmra.mxu0 %vm316_vm1, %v311_v3  ;;  %v305_v5 = vld [vmem:[%s291_s17] sm:$0xff]  ;;  %v313_v7 = vld [vmem:[%s297_s14 + $0x10] sm:$0xff]  ;;  %v306_v8 = vld [vmem:[%s291_s17 + $0x8] sm:$0xff] }
  0x11   : > { %549 = vmatmul.msk.f32.vlgmr.msra.gmra.mxu3 %vm316_vm1, %v312_v4  ;;  %552 = vmatmul.msk.f32.vlgmr.msra.gmra.mxu1 %vm362_vm2, %v305_v5  ;;  %v308_v9 = vld [vmem:[%s291_s17 + $0x18] sm:$0xff]  ;;  %v570_v16 = vld [vmem:[%s695_s5] ss:$0 sm:$0xff] }
  0x12   : > { %554 = vmatmul.msk.f32.vlgmr.msra.gmra.mxu2 %vm362_vm2, %v307_v6  ;;  %v314_v10 = vld [vmem:[%s297_s14 + $0x18] sm:$0xff] }
  0x19   : > { %550 = vmatmul.msk.f32.gmra.mxu3 %vm316_vm1, %v313_v7  ;;  %553 = vmatmul.msk.f32.gmra.mxu1 %vm362_vm2, %v306_v8 }
  0x1a   : > { %555 = vmatmul.msk.f32.gmra.mxu2 %vm362_vm2, %v308_v9 }
  0x21   : > { %551 = vmatmul.msk.f32.gmra.mxu3 %vm316_vm1, %v314_v10 }
  0x8d   : > { %v350_v11 = vpop.f32.mrf.mxu0 }
  0x8e   : > { %v392_v13 = vpop.f32.mrf.mxu1 }
  0x8f   : > { %v393_v14 = vadd.f32 %v392_v13, %v350_v11 }
  0x91   : > { %v408_v15 = vadd.f32 %v569_v12, %v393_v14 }
  0x93   : > { %v412_v17 = vmax.f32 %v408_v15, 0.0 }
  0x94   : > { %v353_v18 = vpop.f32.mrf.mxu3 }
  0x95   : > { %v420_v19 = vmul.f32 %v570_v16, %v412_v17  ;;  %v398_v23 = vpop.f32.mrf.mxu2 }
  0x96   : > { %v395_v20 = vpop.f32.mrf.mxu1 }
  0x97   : > { %v396_v21 = vadd.f32 %v395_v20, %v353_v18  ;;  %v425_v22 = vsel %vm424_vm3, %v420_v19, 0.0 }
  0x98   : > { %426 = vadd.xlane.f32.xlu0 %v425_v22 }
  0x99   : > { %v409_v24 = vadd.f32 %v569_v12, %v396_v21 }
  0x9b   : > { %v413_v25 = vmax.f32 %v409_v24, 0.0 }
  0x9c   : > { %v356_v26 = vpop.f32.mrf.mxu3 }
  0x9d   : > { %v399_v27 = vadd.f32 %v398_v23, %v356_v26  ;;  %v421_v28 = vmul.f32 %v570_v16, %v413_v25  ;;  %v401_v32 = vpop.f32.mrf.mxu2 }
  0x9f   : > { %v410_v29 = vadd.f32 %v569_v12, %v399_v27  ;;  %v428_v30 = vsel %vm424_vm3, %v421_v28, 0.0 }
  0xa0   : > { %429 = vadd.xlane.f32.xlu0 %v428_v30 }
  0xa1   : > { %v414_v31 = vmax.f32 %v410_v29, 0.0 }
  0xa3   : > { %v422_v33 = vmul.f32 %v570_v16, %v414_v31 }
  0xa4   : > { %v359_v34 = vpop.f32.mrf.mxu3 }
  0xa5   : > { %v402_v35 = vadd.f32 %v401_v32, %v359_v34  ;;  %v431_v36 = vsel %vm424_vm3, %v422_v33, 0.0 }
  0xa6   : > { %432 = vadd.xlane.f32.xlu1 %v431_v36 }
  0xa7   : > { %v411_v37 = vadd.f32 %v569_v12, %v402_v35 }
  0xa9   : > { %v415_v38 = vmax.f32 %v411_v37, 0.0 }
  0xab   : > { %v423_v39 = vmul.f32 %v570_v16, %v415_v38 }
  0xad   : > { %v434_v40 = vsel %vm424_vm3, %v423_v39, 0.0 }
  0xae   : > { %435 = vadd.xlane.f32.xlu1 %v434_v40 }
 0x10b   : > { %v427_v42 = vpop.xlane.xlu0 %426 }
 0x10c   : > { %v439_v43 = vadd.f32 %v438_v41, %v427_v42 }
 0x10e   : > { %v443_v44 = vsub.f32 0.0, %v439_v43 }
 0x110   : > { %v447_v45 = vmul.f32 1.442695, %v443_v44 }
 0x112   : > { %571 = vpow2.f32 %v447_v45 }
 0x113   : > { %v430_v46 = vpop.xlane.xlu0 %429 }
 0x114   : > { %v440_v47 = vadd.f32 %v438_v41, %v430_v46 }
 0x116   : > { %v444_v48 = vsub.f32 0.0, %v440_v47 }
 0x118   : > { %v572_v49 = vpop.eup %571  ;;  %v449_v50 = vmul.f32 1.442695, %v444_v48 }
 0x119   : > { %v433_v51 = vpop.xlane.xlu1 %432  ;;  %v455_v52 = vadd.f32 1.0, %v572_v49 }
 0x11a   : > { %v441_v53 = vadd.f32 %v438_v41, %v433_v51  ;;  %573 = vpow2.f32 %v449_v50 }
 0x11b   : > { %575 = vrcp.f32 %v455_v52 }
 0x11c   : > { %v445_v54 = vsub.f32 0.0, %v441_v53 }
 0x11e   : > { %v451_v55 = vmul.f32 1.442695, %v445_v54 }
 0x120   : > { %577 = vpow2.f32 %v451_v55  ;;  %v574_v56 = vpop.eup %573 }
 0x121   : > { %v436_v57 = vpop.xlane.xlu1 %435  ;;  %v576_v58 = vpop.eup %575  ;;  %v456_v59 = vadd.f32 1.0, %v574_v56 }
 0x122   : > { %v442_v60 = vadd.f32 %v438_v41, %v436_v57  ;;  %464 = vst.msk [vmem:[%s303_s25] sm:$0xff] %vm463_vm4, %v576_v58 }
 0x123   : > { %579 = vrcp.f32 %v456_v59 }
 0x124   : > { %v446_v61 = vsub.f32 0.0, %v442_v60 }
 0x126   : > { %v578_v62 = vpop.eup %577  ;;  %v453_v63 = vmul.f32 1.442695, %v446_v61 }
 0x127   : > { %v457_v0 = vadd.f32 1.0, %v578_v62 }
 0x128   : > { %581 = vpow2.f32 %v453_v63 }
 0x129   : > { %583 = vrcp.f32 %v457_v0  ;;  %v580_v1 = vpop.eup %579 }
 0x12a   : > { %465 = vst.msk [vmem:[%s303_s25 + $0x8] sm:$0xff] %vm463_vm4, %v580_v1 }
 0x12e   : > { %v582_v2 = vpop.eup %581 }
 0x12f   : > { %v584_v3 = vpop.eup %583  ;;  %v458_v4 = vadd.f32 1.0, %v582_v2 }
 0x130   : > { %466 = vst.msk [vmem:[%s303_s25 + $0x10] sm:$0xff] %vm463_vm4, %v584_v3 }
 0x131   : > { %585 = vrcp.f32 %v458_v4 }
 0x137   : > { %v586_v5 = vpop.eup %585 }
 0x138   : > { %467 = vst.msk [vmem:[%s303_s25 + $0x18] sm:$0xff] %vm463_vm4, %v586_v5 }
 0x139 PF: > { %s18_s26 = sadd.s32 1, %s593_s26  }
 0x13a   : > { %p15_p4 = scmp.ge.s32.totalorder %s18_s26, 4  }
 0x13c   :  { %17 = sbr.rel (!%p15_p4) target bundleno = 2 (0x2), region = 81 }

</bundles_post_ra>
